<compile_context>
chip_gen: v7x
topology: tpu7x:2x2x1
jax: 0.10.0
libtpu: 0.0.40
codegen_flags: <defaults>
</compile_context>

<pallas_src>
import functools
import math

import jax
import jax.numpy as jnp
from jax import lax
from jax.experimental import pallas as pl
from jax.experimental.pallas import tpu as pltpu

D_MODEL = 32
HEADS = 4
D_K = 8
D_V = 8
D_FF = 64
EPS = 1e-6       # LayerNorm epsilon (onmt default)
NEG_INF = -1e18  # masked_fill value used by onmt MultiHeadedAttention


def _layer_norm(x, g, b):
    mu = jnp.mean(x, axis=-1, keepdims=True)
    var = jnp.mean((x - mu) ** 2, axis=-1, keepdims=True)
    return (x - mu) * lax.rsqrt(var + EPS) * g + b


def encoder_layer_kernel(x_ref, bias_ref, ln_ref,
                         wqkv_ref, bqkv_ref, wo_ref, bo_ref,
                         w1_ref, b1_ref, w2_ref, b2_ref,
                         o_ref, *, tb, seq, heads, d_k, use_bf16):
    f32 = jnp.float32
    mm_dtype = jnp.bfloat16 if use_bf16 else f32
    hd = heads * d_k
    rows = tb * seq

    def mm(a, b):                                    # 2-D MXU matmul, f32 accumulate
        return jnp.dot(a, b, preferred_element_type=f32)

    x = x_ref[...]                                   # (rows, D) f32
    ln = ln_ref[...]                                 # (4, D): ln1_g, ln1_b, ln2_g, ln2_b
    bias = bias_ref[...]                             # (tb, 1|seq, seq) f32 additive mask

    # ---- pre-attention LayerNorm (f32); single operand cast (hoisted) ----
    xn = _layer_norm(x, ln[0:1, :], ln[1:2, :]).astype(mm_dtype)

    # ---- fused Q/K/V projection: one (rows, D) @ (D, 3*H*d_k) matmul ----
    qkv = mm(xn, wqkv_ref[...]) + bqkv_ref[...]      # (rows, 3*hd) f32

    # Heads stacked along the leading (batch) axis so score/context become ONE batched
    # 3-D einsum pair instead of an unrolled per-head loop (no transposes required).
    def stack_heads(base):
        return jnp.concatenate(
            [qkv[:, base + h * d_k: base + (h + 1) * d_k].reshape(tb, seq, d_k)
             for h in range(heads)], axis=0).astype(mm_dtype)     # (heads*tb, seq, d_k)

    q3 = stack_heads(0)          # 1/sqrt(d_k) already folded into Wq/bq on the host
    k3 = stack_heads(hd)
    v3 = stack_heads(2 * hd)

    s = jnp.einsum("bqd,bkd->bqk", q3, k3,
                   preferred_element_type=f32)                    # (heads*tb, seq, seq)
    s = (s.reshape(heads, tb, seq, seq) + bias[None]).reshape(heads * tb, seq, seq)

    # softmax in f32, normalization deferred to after the p@v contraction
    s_max = jnp.max(s, axis=-1, keepdims=True)
    p = jnp.exp(s - s_max)
    denom = jnp.sum(p, axis=-1, keepdims=True)
    inv = pl.reciprocal(denom, approx=True) if use_bf16 else 1.0 / denom
    ctx = jnp.einsum("bqk,bkd->bqd", p.astype(mm_dtype), v3,
                     preferred_element_type=f32) * inv            # (heads*tb, seq, d_v)

    # Re-pack heads onto the lane axis and run ONE fused output projection.
    ctx_all = jnp.concatenate(
        [ctx[h * tb:(h + 1) * tb].reshape(rows, d_k) for h in range(heads)],
        axis=-1).astype(mm_dtype)                                 # (rows, H*d_v)
    out = mm(ctx_all, wo_ref[...]) + bo_ref[...] + x              # dropout = identity

    # ---- position-wise feed forward (pre-LN, residual) ----
    on = _layer_norm(out, ln[2:3, :], ln[3:4, :]).astype(mm_dtype)
    h1 = jnp.maximum(mm(on, w1_ref[...]) + b1_ref[...], 0.0)
    ffn = mm(h1.astype(mm_dtype), w2_ref[...]) + b2_ref[...]
    o_ref[...] = (ffn + out).astype(o_ref.dtype)


def pack_params(params, *, use_bf16=True):
    """Pack the 16 module parameters into 9 slabs; fold the 1/sqrt(d_k) scale and
    pre-cast the matmul weight slabs to bf16 for the fast path."""
    (ln1_g, ln1_b, wq, bq, wk, bk, wv, bv, wo, bo,
     ln2_g, ln2_b, w1, b1, w2, b2) = params
    assert D_K == D_V, "fused output projection assumes d_k == d_v"
    scale = 1.0 / math.sqrt(D_K)
    wdt = jnp.bfloat16 if use_bf16 else jnp.float32

    ln_pack = jnp.concatenate([ln1_g, ln1_b, ln2_g, ln2_b], axis=0)        # (4, D)
    wqkv = jnp.concatenate([wq * scale, wk, wv], axis=1).astype(wdt)       # (D, 3*H*dk)
    bqkv = jnp.concatenate([bq * scale, bk, bv], axis=1).astype(jnp.float32)  # (1, 3*H*dk)

    return [ln_pack, wqkv, bqkv,
            wo.astype(wdt), bo,           # (H*dv, D), (1, D)
            w1.astype(wdt), b1,           # (D, d_ff), (1, d_ff)
            w2.astype(wdt), b2]           # (d_ff, D), (1, D)


def _tpu_cores_and_vmem():
    """(# TensorCores the grid can be split across, safe scoped-VMEM limit in bytes)."""
    try:
        kind = jax.devices()[0].device_kind.lower()
    except Exception:
        kind = ""
    if "v7" in kind:
        return 2, 32 * 1024 * 1024          # 2 TCs / chip, 64 MiB physical VMEM per TC
    if any(t in kind for t in ("v5e", "v5 lite", "v5lite", "v6")):
        return 1, 64 * 1024 * 1024          # single TC, 128 MiB physical VMEM
    if any(t in kind for t in ("v4", "v5p", "v5")):
        return 2, 32 * 1024 * 1024          # megacore: 2 TCs share the chip
    return 1, 32 * 1024 * 1024              # unknown: conservative defaults


def transformer_encoder_layer(x, mask, params, *, use_bf16=True):
    B, S, D = x.shape
    assert D == D_MODEL
    assert S % 8 == 0, "seq len must be a multiple of the 8-row sublane tile"

    # Host-precomputed additive attention bias (no in-kernel compare/select/broadcast).
    # Full (B,S,S) per-query masks are applied exactly; (B,S)/(B,1,S) key-padding masks
    # use the compact broadcast form.
    if mask.ndim == 2:
        m = mask[:, None, :]
    else:
        assert mask.ndim == 3 and mask.shape[0] == B and mask.shape[-1] == S
        m = mask
    bias = jnp.where(m != 0, NEG_INF, 0.0).astype(jnp.float32)     # (B, 1|S, S)
    sq = bias.shape[1]

    packed = pack_params(params, use_bf16=use_bf16)
    cores, vmem_limit = _tpu_cores_and_vmem()

    # Rows-per-step tile sized from the VMEM budget (not a fixed constant): keep the
    # per-step working set (double-buffered I/O + mask blocks, fused qkv, head-batched
    # scores/probs, FFN intermediates) under ~half the scoped-VMEM limit.
    bytes_per_row = (
        4 * D_MODEL * 4                     # double-buffered f32 input + output blocks
        + 3 * HEADS * D_K * 10              # fused qkv (f32) + q/k/v stacks (f32 + bf16)
        + 3 * HEADS * S * 4                 # scores + probs (+ bf16 copy), all heads
        + 2 * sq * 4                        # double-buffered additive-mask block
        + HEADS * D_V * 4 + 8 * D_MODEL     # ctx / ctx_all / residual temps
        + 6 * D_FF + 12 * D_MODEL           # FFN intermediates + LN temps
    )
    rows_budget = (vmem_limit // 2) // bytes_per_row
    rows_target = max(S, min(4096, rows_budget))

    tb = max(1, min(B, rows_target // S))               # sequences per grid step
    if cores > 1 and B >= cores:
        tb = min(tb, (B + cores - 1) // cores)          # >= 1 step per TensorCore
    # Pad the batch up to a multiple of tb (instead of shrinking tb for odd/prime B).
    n_steps = (B + tb - 1) // tb
    B_pad = n_steps * tb
    if B_pad != B:
        x = jnp.pad(x, ((0, B_pad - B), (0, 0), (0, 0)))
        bias = jnp.pad(bias, ((0, B_pad - B), (0, 0), (0, 0)))

    x2 = x.reshape(B_pad * S, D)                        # 2-D row slab

    def full_spec(p):
        return pl.BlockSpec(p.shape, lambda i, _n=p.ndim: (0,) * _n)

    in_specs = [
        pl.BlockSpec((tb * S, D), lambda i: (i, 0)),    # activations: tb*S rows / step
        pl.BlockSpec((tb, sq, S), lambda i: (i, 0, 0)), # additive attention-mask bias
    ] + [full_spec(p) for p in packed]
    out_specs = pl.BlockSpec((tb * S, D), lambda i: (i, 0))

    kernel = functools.partial(encoder_layer_kernel, tb=tb, seq=S,
                               heads=HEADS, d_k=D_K, use_bf16=use_bf16)

    out2 = pl.pallas_call(
        kernel,
        out_shape=jax.ShapeDtypeStruct((B_pad * S, D), jnp.float32),
        grid_spec=pltpu.PrefetchScalarGridSpec(
            num_scalar_prefetch=0,
            grid=(n_steps,),
            in_specs=in_specs,
            out_specs=out_specs,
        ),
        compiler_params=pltpu.CompilerParams(
            dimension_semantics=("parallel",),
            vmem_limit_bytes=vmem_limit,
        ),
    )(x2, bias, *packed)
    return out2[: B * S].reshape(B, S, D)


def init_params(key):
    ks = iter(jax.random.split(key, 16))

    def lin(k, fan_in, fan_out):
        kw, kb = jax.random.split(k)
        w = jax.random.normal(kw, (fan_in, fan_out), jnp.float32) / math.sqrt(fan_in)
        b = 0.02 * jax.random.normal(kb, (1, fan_out), jnp.float32)
        return w, b

    ln1_g = 1.0 + 0.1 * jax.random.normal(next(ks), (1, D_MODEL), jnp.float32)
    ln1_b = 0.1 * jax.random.normal(next(ks), (1, D_MODEL), jnp.float32)
    wq, bq = lin(next(ks), D_MODEL, HEADS * D_K)
    wk, bk = lin(next(ks), D_MODEL, HEADS * D_K)
    wv, bv = lin(next(ks), D_MODEL, HEADS * D_V)
    wo, bo = lin(next(ks), HEADS * D_V, D_MODEL)
    ln2_g = 1.0 + 0.1 * jax.random.normal(next(ks), (1, D_MODEL), jnp.float32)
    ln2_b = 0.1 * jax.random.normal(next(ks), (1, D_MODEL), jnp.float32)
    w1, b1 = lin(next(ks), D_MODEL, D_FF)
    w2, b2 = lin(next(ks), D_FF, D_MODEL)
    return [ln1_g, ln1_b, wq, bq, wk, bk, wv, bv, wo, bo,
            ln2_g, ln2_b, w1, b1, w2, b2]


def reference(x, mask, params):
    (ln1_g, ln1_b, wq, bq, wk, bk, wv, bv, wo, bo,
     ln2_g, ln2_b, w1, b1, w2, b2) = params

    def ln(t, g, b):
        mu = t.mean(-1, keepdims=True)
        var = ((t - mu) ** 2).mean(-1, keepdims=True)
        return (t - mu) / jnp.sqrt(var + EPS) * g + b

    B, S, _ = x.shape
    xn = ln(x, ln1_g, ln1_b)
    q = (xn @ wq + bq).reshape(B, S, HEADS, D_K).transpose(0, 2, 1, 3)
    k = (xn @ wk + bk).reshape(B, S, HEADS, D_K).transpose(0, 2, 1, 3)
    v = (xn @ wv + bv).reshape(B, S, HEADS, D_V).transpose(0, 2, 1, 3)
    s = jnp.einsum("bhqd,bhkd->bhqk", q, k) / math.sqrt(D_K)
    s = jnp.where(mask[:, None, :, :] != 0, NEG_INF, s)
    p = jax.nn.softmax(s, axis=-1)
    ctx = jnp.einsum("bhqk,bhkd->bhqd", p, v).transpose(0, 2, 1, 3)
    ctx = ctx.reshape(B, S, HEADS * D_V)
    out = (ctx @ wo + bo) + x
    on = ln(out, ln2_g, ln2_b)
    return jnp.maximum(on @ w1 + b1, 0.0) @ w2 + b2 + out


if __name__ == "__main__":
    B, S = 2, 8
    key = jax.random.PRNGKey(0)
    k_x, k_p = jax.random.split(key)

    x = jax.random.normal(k_x, (B, S, D_MODEL), jnp.float32)

    # padding mask: sequence 0 has length 8, sequence 1 has length 5
    lengths = jnp.array([S, 5], dtype=jnp.int32)
    pad = (jnp.arange(S)[None, :] >= lengths[:, None]).astype(jnp.int32)   # (B, S)
    mask = jnp.tile(pad[:, None, :], (1, S, 1)).astype(jnp.int32)          # (B, S, S)

    params = init_params(k_p)
    ref = reference(x, mask, params)

    # f32 MXU-operand path: strict check against the f32 reference
    out_f32 = jax.block_until_ready(
        transformer_encoder_layer(x, mask, params, use_bf16=False))
    assert out_f32.shape == (B, S, D_MODEL)
    assert jnp.allclose(out_f32, ref, rtol=1e-4, atol=1e-4), \
        f"f32 max err {jnp.max(jnp.abs(out_f32 - ref))}"

    # default bf16 MXU-operand path (fast path on v5e/v6e/v7x): loose check
    out = jax.block_until_ready(transformer_encoder_layer(x, mask, params))
    rel = jnp.max(jnp.abs(out - ref)) / jnp.maximum(1.0, jnp.max(jnp.abs(ref)))
    assert rel < 0.15, f"bf16 relative err {rel}"

    # compact (B, S) key-padding mask path must match the full (B, S, S) mask path
    out_kp = jax.block_until_ready(transformer_encoder_layer(x, pad, params))
    assert jnp.allclose(out_kp, out, rtol=1e-5, atol=1e-5), "key-padding path mismatch"

    print("KERNEL_OK")
</pallas_src>

<mosaic_0001>
module attributes {stable_mosaic.version = 11 : i64} {
  func.func @encoder_layer_kernel(%arg0: i32, %arg1: memref<16x32xf32, #tpu.memory_space<vmem>>, %arg2: memref<2x8x8xf32, #tpu.memory_space<vmem>>, %arg3: memref<4x32xf32, #tpu.memory_space<vmem>>, %arg4: memref<32x96xf32, #tpu.memory_space<vmem>>, %arg5: memref<1x96xf32, #tpu.memory_space<vmem>>, %arg6: memref<32x32xf32, #tpu.memory_space<vmem>>, %arg7: memref<1x32xf32, #tpu.memory_space<vmem>>, %arg8: memref<32x64xf32, #tpu.memory_space<vmem>>, %arg9: memref<1x64xf32, #tpu.memory_space<vmem>>, %arg10: memref<64x32xf32, #tpu.memory_space<vmem>>, %arg11: memref<1x32xf32, #tpu.memory_space<vmem>>, %arg12: memref<16x32xf32, #tpu.memory_space<vmem>>) attributes {dimension_semantics = [#tpu.dimension_semantics<parallel>], iteration_bounds = array<i64: 1>, scalar_prefetch = 0 : i64, scratch_operands = 0 : i64, tpu.core_type = #tpu.core_type<tc>, window_params = [{transform_indices = @transform_0, window_bounds = array<i64: 16, 32>}, {transform_indices = @transform_1, window_bounds = array<i64: 2, 8, 8>}, {pipeline_mode = #tpu.pipeline_mode<synchronous>, transform_indices = @transform_2, window_bounds = array<i64: 4, 32>}, {pipeline_mode = #tpu.pipeline_mode<synchronous>, transform_indices = @transform_3, window_bounds = array<i64: 32, 96>}, {pipeline_mode = #tpu.pipeline_mode<synchronous>, transform_indices = @transform_4, window_bounds = array<i64: 1, 96>}, {pipeline_mode = #tpu.pipeline_mode<synchronous>, transform_indices = @transform_5, window_bounds = array<i64: 32, 32>}, {pipeline_mode = #tpu.pipeline_mode<synchronous>, transform_indices = @transform_6, window_bounds = array<i64: 1, 32>}, {pipeline_mode = #tpu.pipeline_mode<synchronous>, transform_indices = @transform_7, window_bounds = array<i64: 32, 64>}, {pipeline_mode = #tpu.pipeline_mode<synchronous>, transform_indices = @transform_8, window_bounds = array<i64: 1, 64>}, {pipeline_mode = #tpu.pipeline_mode<synchronous>, transform_indices = @transform_9, window_bounds = array<i64: 64, 32>}, {pipeline_mode = #tpu.pipeline_mode<synchronous>, transform_indices = @transform_10, window_bounds = array<i64: 1, 32>}, {transform_indices = @transform_11, window_bounds = array<i64: 16, 32>}]} {
    %c0 = arith.constant 0 : index
    %c0_0 = arith.constant 0 : index
    %0 = vector.load %arg1[%c0, %c0_0] : memref<16x32xf32, #tpu.memory_space<vmem>>, vector<16x32xf32>
    %c0_1 = arith.constant 0 : index
    %c0_2 = arith.constant 0 : index
    %1 = vector.load %arg3[%c0_1, %c0_2] : memref<4x32xf32, #tpu.memory_space<vmem>>, vector<4x32xf32>
    %c0_3 = arith.constant 0 : index
    %c0_4 = arith.constant 0 : index
    %c0_5 = arith.constant 0 : index
    %2 = vector.load %arg2[%c0_3, %c0_4, %c0_5] : memref<2x8x8xf32, #tpu.memory_space<vmem>>, vector<2x8x8xf32>
    %3 = vector.extract_strided_slice %1 {offsets = [0, 0], sizes = [1, 32], strides = [1, 1]} : vector<4x32xf32> to vector<1x32xf32>
    %4 = vector.extract_strided_slice %1 {offsets = [1, 0], sizes = [1, 32], strides = [1, 1]} : vector<4x32xf32> to vector<1x32xf32>
    %cst = arith.constant dense<0.000000e+00> : vector<16xf32>
    %5 = vector.multi_reduction <add>, %0, %cst [1] : vector<16x32xf32> to vector<16xf32>
    %6 = vector.shape_cast %5 : vector<16xf32> to vector<16x1xf32>
    %cst_6 = arith.constant 3.200000e+01 : f32
    %7 = vector.broadcast %cst_6 : f32 to vector<16x1xf32>
    %8 = arith.divf %6, %7 : vector<16x1xf32>
    %9 = vector.broadcast %8 : vector<16x1xf32> to vector<16x32xf32>
    %10 = arith.subf %0, %9 : vector<16x32xf32>
    %11 = arith.mulf %10, %10 : vector<16x32xf32>
    %cst_7 = arith.constant dense<0.000000e+00> : vector<16xf32>
    %12 = vector.multi_reduction <add>, %11, %cst_7 [1] : vector<16x32xf32> to vector<16xf32>
    %13 = vector.shape_cast %12 : vector<16xf32> to vector<16x1xf32>
    %cst_8 = arith.constant 3.200000e+01 : f32
    %14 = vector.broadcast %cst_8 : f32 to vector<16x1xf32>
    %15 = arith.divf %13, %14 : vector<16x1xf32>
    %16 = vector.broadcast %8 : vector<16x1xf32> to vector<16x32xf32>
    %17 = arith.subf %0, %16 : vector<16x32xf32>
    %cst_9 = arith.constant 9.99999997E-7 : f32
    %18 = vector.broadcast %cst_9 : f32 to vector<16x1xf32>
    %19 = arith.addf %15, %18 : vector<16x1xf32>
    %20 = math.rsqrt %19 : vector<16x1xf32>
    %21 = vector.broadcast %20 : vector<16x1xf32> to vector<16x32xf32>
    %22 = arith.mulf %17, %21 : vector<16x32xf32>
    %23 = vector.broadcast %3 : vector<1x32xf32> to vector<16x32xf32>
    %24 = arith.mulf %22, %23 : vector<16x32xf32>
    %25 = vector.broadcast %4 : vector<1x32xf32> to vector<16x32xf32>
    %26 = arith.addf %24, %25 : vector<16x32xf32>
    %c0_10 = arith.constant 0 : index
    %c0_11 = arith.constant 0 : index
    %27 = vector.load %arg4[%c0_10, %c0_11] : memref<32x96xf32, #tpu.memory_space<vmem>>, vector<32x96xf32>
    %cst_12 = arith.constant dense<0.000000e+00> : vector<16x96xf32>
    %28 = tpu.matmul %26, %27, %cst_12 {dimension_numbers = #tpu.dot_dimension_numbers<[1], [0], [0], [1], [0, 0, 1, 1], [], []>} : vector<16x32xf32>, vector<32x96xf32>, vector<16x96xf32> -> vector<16x96xf32>
    %c0_13 = arith.constant 0 : index
    %c0_14 = arith.constant 0 : index
    %29 = vector.load %arg5[%c0_13, %c0_14] : memref<1x96xf32, #tpu.memory_space<vmem>>, vector<1x96xf32>
    %30 = vector.broadcast %29 : vector<1x96xf32> to vector<16x96xf32>
    %31 = arith.addf %28, %30 : vector<16x96xf32>
    %32 = vector.extract_strided_slice %31 {offsets = [0, 0], sizes = [16, 8], strides = [1, 1]} : vector<16x96xf32> to vector<16x8xf32>
    %33 = vector.shape_cast %32 : vector<16x8xf32> to vector<2x8x8xf32>
    %34 = vector.extract_strided_slice %31 {offsets = [0, 8], sizes = [16, 8], strides = [1, 1]} : vector<16x96xf32> to vector<16x8xf32>
    %35 = vector.shape_cast %34 : vector<16x8xf32> to vector<2x8x8xf32>
    %36 = vector.extract_strided_slice %31 {offsets = [0, 16], sizes = [16, 8], strides = [1, 1]} : vector<16x96xf32> to vector<16x8xf32>
    %37 = vector.shape_cast %36 : vector<16x8xf32> to vector<2x8x8xf32>
    %38 = vector.extract_strided_slice %31 {offsets = [0, 24], sizes = [16, 8], strides = [1, 1]} : vector<16x96xf32> to vector<16x8xf32>
    %39 = vector.shape_cast %38 : vector<16x8xf32> to vector<2x8x8xf32>
    %40 = tpu.concatenate %33, %35, %37, %39 in 0 : vector<2x8x8xf32>, vector<2x8x8xf32>, vector<2x8x8xf32>, vector<2x8x8xf32> -> vector<8x8x8xf32>
    %41 = vector.extract_strided_slice %31 {offsets = [0, 32], sizes = [16, 8], strides = [1, 1]} : vector<16x96xf32> to vector<16x8xf32>
    %42 = vector.shape_cast %41 : vector<16x8xf32> to vector<2x8x8xf32>
    %43 = vector.extract_strided_slice %31 {offsets = [0, 40], sizes = [16, 8], strides = [1, 1]} : vector<16x96xf32> to vector<16x8xf32>
    %44 = vector.shape_cast %43 : vector<16x8xf32> to vector<2x8x8xf32>
    %45 = vector.extract_strided_slice %31 {offsets = [0, 48], sizes = [16, 8], strides = [1, 1]} : vector<16x96xf32> to vector<16x8xf32>
    %46 = vector.shape_cast %45 : vector<16x8xf32> to vector<2x8x8xf32>
    %47 = vector.extract_strided_slice %31 {offsets = [0, 56], sizes = [16, 8], strides = [1, 1]} : vector<16x96xf32> to vector<16x8xf32>
    %48 = vector.shape_cast %47 : vector<16x8xf32> to vector<2x8x8xf32>
    %49 = tpu.concatenate %42, %44, %46, %48 in 0 : vector<2x8x8xf32>, vector<2x8x8xf32>, vector<2x8x8xf32>, vector<2x8x8xf32> -> vector<8x8x8xf32>
    %50 = vector.extract_strided_slice %31 {offsets = [0, 64], sizes = [16, 8], strides = [1, 1]} : vector<16x96xf32> to vector<16x8xf32>
    %51 = vector.shape_cast %50 : vector<16x8xf32> to vector<2x8x8xf32>
    %52 = vector.extract_strided_slice %31 {offsets = [0, 72], sizes = [16, 8], strides = [1, 1]} : vector<16x96xf32> to vector<16x8xf32>
    %53 = vector.shape_cast %52 : vector<16x8xf32> to vector<2x8x8xf32>
    %54 = vector.extract_strided_slice %31 {offsets = [0, 80], sizes = [16, 8], strides = [1, 1]} : vector<16x96xf32> to vector<16x8xf32>
    %55 = vector.shape_cast %54 : vector<16x8xf32> to vector<2x8x8xf32>
    %56 = vector.extract_strided_slice %31 {offsets = [0, 88], sizes = [16, 8], strides = [1, 1]} : vector<16x96xf32> to vector<16x8xf32>
    %57 = vector.shape_cast %56 : vector<16x8xf32> to vector<2x8x8xf32>
    %58 = tpu.concatenate %51, %53, %55, %57 in 0 : vector<2x8x8xf32>, vector<2x8x8xf32>, vector<2x8x8xf32>, vector<2x8x8xf32> -> vector<8x8x8xf32>
    "tpu.trace_start"() <{level = 10 : i32, message = "bqd,bkd->bqk"}> : () -> ()
    %cst_15 = arith.constant dense<0.000000e+00> : vector<8x8x8xf32>
    %59 = tpu.matmul %40, %49, %cst_15 {dimension_numbers = #tpu.dot_dimension_numbers<[2], [2], [1], [1], [0, 0, 0, 1, 1, 1], [0], [0]>} : vector<8x8x8xf32>, vector<8x8x8xf32>, vector<8x8x8xf32> -> vector<8x8x8xf32>
    "tpu.trace_stop"() : () -> ()
    %60 = vector.shape_cast %59 : vector<8x8x8xf32> to vector<4x2x8x8xf32>
    %61 = vector.shape_cast %2 : vector<2x8x8xf32> to vector<1x2x8x8xf32>
    %62 = vector.broadcast %61 : vector<1x2x8x8xf32> to vector<4x2x8x8xf32>
    %63 = arith.addf %60, %62 : vector<4x2x8x8xf32>
    %64 = vector.shape_cast %63 : vector<4x2x8x8xf32> to vector<8x8x8xf32>
    %cst_16 = arith.constant dense<0xFF800000> : vector<8x8xf32>
    %65 = vector.multi_reduction <maximumf>, %64, %cst_16 [2] : vector<8x8x8xf32> to vector<8x8xf32>
    %66 = vector.shape_cast %65 : vector<8x8xf32> to vector<8x8x1xf32>
    %67 = vector.broadcast %66 : vector<8x8x1xf32> to vector<8x8x8xf32>
    %68 = arith.subf %64, %67 : vector<8x8x8xf32>
    %69 = math.exp %68 : vector<8x8x8xf32>
    %cst_17 = arith.constant dense<0.000000e+00> : vector<8x8xf32>
    %70 = vector.multi_reduction <add>, %69, %cst_17 [2] : vector<8x8x8xf32> to vector<8x8xf32>
    %71 = vector.shape_cast %70 : vector<8x8xf32> to vector<8x8x1xf32>
    %cst_18 = arith.constant 1.000000e+00 : f32
    %72 = vector.broadcast %cst_18 : f32 to vector<8x8x1xf32>
    %73 = arith.divf %72, %71 : vector<8x8x1xf32>
    "tpu.trace_start"() <{level = 10 : i32, message = "bqk,bkd->bqd"}> : () -> ()
    %cst_19 = arith.constant dense<0.000000e+00> : vector<8x8x8xf32>
    %74 = tpu.matmul %69, %58, %cst_19 {dimension_numbers = #tpu.dot_dimension_numbers<[2], [1], [1], [2], [0, 0, 0, 1, 1, 2], [0], [0]>} : vector<8x8x8xf32>, vector<8x8x8xf32>, vector<8x8x8xf32> -> vector<8x8x8xf32>
    "tpu.trace_stop"() : () -> ()
    %75 = vector.broadcast %73 : vector<8x8x1xf32> to vector<8x8x8xf32>
    %76 = arith.mulf %74, %75 : vector<8x8x8xf32>
    %77 = vector.extract_strided_slice %76 {offsets = [0, 0, 0], sizes = [2, 8, 8], strides = [1, 1, 1]} : vector<8x8x8xf32> to vector<2x8x8xf32>
    %78 = vector.shape_cast %77 : vector<2x8x8xf32> to vector<16x8xf32>
    %79 = vector.extract_strided_slice %76 {offsets = [2, 0, 0], sizes = [2, 8, 8], strides = [1, 1, 1]} : vector<8x8x8xf32> to vector<2x8x8xf32>
    %80 = vector.shape_cast %79 : vector<2x8x8xf32> to vector<16x8xf32>
    %81 = vector.extract_strided_slice %76 {offsets = [4, 0, 0], sizes = [2, 8, 8], strides = [1, 1, 1]} : vector<8x8x8xf32> to vector<2x8x8xf32>
    %82 = vector.shape_cast %81 : vector<2x8x8xf32> to vector<16x8xf32>
    %83 = vector.extract_strided_slice %76 {offsets = [6, 0, 0], sizes = [2, 8, 8], strides = [1, 1, 1]} : vector<8x8x8xf32> to vector<2x8x8xf32>
    %84 = vector.shape_cast %83 : vector<2x8x8xf32> to vector<16x8xf32>
    %85 = tpu.concatenate %78, %80, %82, %84 in 1 : vector<16x8xf32>, vector<16x8xf32>, vector<16x8xf32>, vector<16x8xf32> -> vector<16x32xf32>
    %c0_20 = arith.constant 0 : index
    %c0_21 = arith.constant 0 : index
    %86 = vector.load %arg6[%c0_20, %c0_21] : memref<32x32xf32, #tpu.memory_space<vmem>>, vector<32x32xf32>
    %cst_22 = arith.constant dense<0.000000e+00> : vector<16x32xf32>
    %87 = tpu.matmul %85, %86, %cst_22 {dimension_numbers = #tpu.dot_dimension_numbers<[1], [0], [0], [1], [0, 0, 1, 1], [], []>} : vector<16x32xf32>, vector<32x32xf32>, vector<16x32xf32> -> vector<16x32xf32>
    %c0_23 = arith.constant 0 : index
    %c0_24 = arith.constant 0 : index
    %88 = vector.load %arg7[%c0_23, %c0_24] : memref<1x32xf32, #tpu.memory_space<vmem>>, vector<1x32xf32>
    %89 = vector.broadcast %88 : vector<1x32xf32> to vector<16x32xf32>
    %90 = arith.addf %87, %89 : vector<16x32xf32>
    %91 = arith.addf %90, %0 : vector<16x32xf32>
    %92 = vector.extract_strided_slice %1 {offsets = [2, 0], sizes = [1, 32], strides = [1, 1]} : vector<4x32xf32> to vector<1x32xf32>
    %93 = vector.extract_strided_slice %1 {offsets = [3, 0], sizes = [1, 32], strides = [1, 1]} : vector<4x32xf32> to vector<1x32xf32>
    %cst_25 = arith.constant dense<0.000000e+00> : vector<16xf32>
    %94 = vector.multi_reduction <add>, %91, %cst_25 [1] : vector<16x32xf32> to vector<16xf32>
    %95 = vector.shape_cast %94 : vector<16xf32> to vector<16x1xf32>
    %cst_26 = arith.constant 3.200000e+01 : f32
    %96 = vector.broadcast %cst_26 : f32 to vector<16x1xf32>
    %97 = arith.divf %95, %96 : vector<16x1xf32>
    %98 = vector.broadcast %97 : vector<16x1xf32> to vector<16x32xf32>
    %99 = arith.subf %91, %98 : vector<16x32xf32>
    %100 = arith.mulf %99, %99 : vector<16x32xf32>
    %cst_27 = arith.constant dense<0.000000e+00> : vector<16xf32>
    %101 = vector.multi_reduction <add>, %100, %cst_27 [1] : vector<16x32xf32> to vector<16xf32>
    %102 = vector.shape_cast %101 : vector<16xf32> to vector<16x1xf32>
    %cst_28 = arith.constant 3.200000e+01 : f32
    %103 = vector.broadcast %cst_28 : f32 to vector<16x1xf32>
    %104 = arith.divf %102, %103 : vector<16x1xf32>
    %105 = vector.broadcast %97 : vector<16x1xf32> to vector<16x32xf32>
    %106 = arith.subf %91, %105 : vector<16x32xf32>
    %cst_29 = arith.constant 9.99999997E-7 : f32
    %107 = vector.broadcast %cst_29 : f32 to vector<16x1xf32>
    %108 = arith.addf %104, %107 : vector<16x1xf32>
    %109 = math.rsqrt %108 : vector<16x1xf32>
    %110 = vector.broadcast %109 : vector<16x1xf32> to vector<16x32xf32>
    %111 = arith.mulf %106, %110 : vector<16x32xf32>
    %112 = vector.broadcast %92 : vector<1x32xf32> to vector<16x32xf32>
    %113 = arith.mulf %111, %112 : vector<16x32xf32>
    %114 = vector.broadcast %93 : vector<1x32xf32> to vector<16x32xf32>
    %115 = arith.addf %113, %114 : vector<16x32xf32>
    %c0_30 = arith.constant 0 : index
    %c0_31 = arith.constant 0 : index
    %116 = vector.load %arg8[%c0_30, %c0_31] : memref<32x64xf32, #tpu.memory_space<vmem>>, vector<32x64xf32>
    %cst_32 = arith.constant dense<0.000000e+00> : vector<16x64xf32>
    %117 = tpu.matmul %115, %116, %cst_32 {dimension_numbers = #tpu.dot_dimension_numbers<[1], [0], [0], [1], [0, 0, 1, 1], [], []>} : vector<16x32xf32>, vector<32x64xf32>, vector<16x64xf32> -> vector<16x64xf32>
    %c0_33 = arith.constant 0 : index
    %c0_34 = arith.constant 0 : index
    %118 = vector.load %arg9[%c0_33, %c0_34] : memref<1x64xf32, #tpu.memory_space<vmem>>, vector<1x64xf32>
    %119 = vector.broadcast %118 : vector<1x64xf32> to vector<16x64xf32>
    %120 = arith.addf %117, %119 : vector<16x64xf32>
    %cst_35 = arith.constant 0.000000e+00 : f32
    %121 = vector.broadcast %cst_35 : f32 to vector<16x64xf32>
    %122 = arith.maximumf %120, %121 : vector<16x64xf32>
    %c0_36 = arith.constant 0 : index
    %c0_37 = arith.constant 0 : index
    %123 = vector.load %arg10[%c0_36, %c0_37] : memref<64x32xf32, #tpu.memory_space<vmem>>, vector<64x32xf32>
    %cst_38 = arith.constant dense<0.000000e+00> : vector<16x32xf32>
    %124 = tpu.matmul %122, %123, %cst_38 {dimension_numbers = #tpu.dot_dimension_numbers<[1], [0], [0], [1], [0, 0, 1, 1], [], []>} : vector<16x64xf32>, vector<64x32xf32>, vector<16x32xf32> -> vector<16x32xf32>
    %c0_39 = arith.constant 0 : index
    %c0_40 = arith.constant 0 : index
    %125 = vector.load %arg11[%c0_39, %c0_40] : memref<1x32xf32, #tpu.memory_space<vmem>>, vector<1x32xf32>
    %126 = vector.broadcast %125 : vector<1x32xf32> to vector<16x32xf32>
    %127 = arith.addf %124, %126 : vector<16x32xf32>
    %128 = arith.addf %127, %91 : vector<16x32xf32>
    %c0_41 = arith.constant 0 : index
    %c0_42 = arith.constant 0 : index
    %129 = vector.load %arg12[%c0_41, %c0_42] : memref<16x32xf32, #tpu.memory_space<vmem>>, vector<16x32xf32>
    tpu.vector_store %arg12[%c0_41, %c0_42], %128 {strides = array<i32>} : memref<16x32xf32, #tpu.memory_space<vmem>>, vector<16x32xf32>,
    return
  }
  func.func @transform_0(%arg0: i32) -> (i32, i32) {
    %c0_i32 = arith.constant 0 : i32
    %c0_i32_0 = arith.constant 0 : i32
    return %arg0, %c0_i32 : i32, i32
  }
  func.func @transform_1(%arg0: i32) -> (i32, i32, i32) {
    %c0_i32 = arith.constant 0 : i32
    %c0_i32_0 = arith.constant 0 : i32
    %c0_i32_1 = arith.constant 0 : i32
    return %arg0, %c0_i32, %c0_i32_0 : i32, i32, i32
  }
  func.func @transform_2(%arg0: i32) -> (i32, i32) {
    %c0_i32 = arith.constant 0 : i32
    %c0_i32_0 = arith.constant 0 : i32
    %c0_i32_1 = arith.constant 0 : i32
    return %c0_i32, %c0_i32_0 : i32, i32
  }
  func.func @transform_3(%arg0: i32) -> (i32, i32) {
    %c0_i32 = arith.constant 0 : i32
    %c0_i32_0 = arith.constant 0 : i32
    %c0_i32_1 = arith.constant 0 : i32
    return %c0_i32, %c0_i32_0 : i32, i32
  }
  func.func @transform_4(%arg0: i32) -> (i32, i32) {
    %c0_i32 = arith.constant 0 : i32
    %c0_i32_0 = arith.constant 0 : i32
    %c0_i32_1 = arith.constant 0 : i32
    return %c0_i32, %c0_i32_0 : i32, i32
  }
  func.func @transform_5(%arg0: i32) -> (i32, i32) {
    %c0_i32 = arith.constant 0 : i32
    %c0_i32_0 = arith.constant 0 : i32
    %c0_i32_1 = arith.constant 0 : i32
    return %c0_i32, %c0_i32_0 : i32, i32
  }
  func.func @transform_6(%arg0: i32) -> (i32, i32) {
    %c0_i32 = arith.constant 0 : i32
    %c0_i32_0 = arith.constant 0 : i32
    %c0_i32_1 = arith.constant 0 : i32
    return %c0_i32, %c0_i32_0 : i32, i32
  }
  func.func @transform_7(%arg0: i32) -> (i32, i32) {
    %c0_i32 = arith.constant 0 : i32
    %c0_i32_0 = arith.constant 0 : i32
    %c0_i32_1 = arith.constant 0 : i32
    return %c0_i32, %c0_i32_0 : i32, i32
  }
  func.func @transform_8(%arg0: i32) -> (i32, i32) {
    %c0_i32 = arith.constant 0 : i32
    %c0_i32_0 = arith.constant 0 : i32
    %c0_i32_1 = arith.constant 0 : i32
    return %c0_i32, %c0_i32_0 : i32, i32
  }
  func.func @transform_9(%arg0: i32) -> (i32, i32) {
    %c0_i32 = arith.constant 0 : i32
    %c0_i32_0 = arith.constant 0 : i32
    %c0_i32_1 = arith.constant 0 : i32
    return %c0_i32, %c0_i32_0 : i32, i32
  }
  func.func @transform_10(%arg0: i32) -> (i32, i32) {
    %c0_i32 = arith.constant 0 : i32
    %c0_i32_0 = arith.constant 0 : i32
    %c0_i32_1 = arith.constant 0 : i32
    return %c0_i32, %c0_i32_0 : i32, i32
  }
  func.func @transform_11(%arg0: i32) -> (i32, i32) {
    %c0_i32 = arith.constant 0 : i32
    %c0_i32_0 = arith.constant 0 : i32
    return %arg0, %c0_i32 : i32, i32
  }
}

</mosaic_0001>

<bundles_post_ra>
// kernel: tpu_custom_call.1
= control target key start
LH: loop header
LB: loop body
LE: loop exit
PB: predicated region body
PF: predicated region fallthrough
CT: control target
= control target key end

     0   :  { %16 = vsyncpa [#allocation3], 0  ;;  %s2775_s0 = inlined_call_operand.hbm [shape: f32[16,32], index: 0, kind: input, shape index: {}]   ;;  %s2776_s1 = inlined_call_operand.hbm [shape: f32[2,8,8], index: 1, kind: input, shape index: {}]   ;;  %s2777_s2 = inlined_call_operand.hbm [shape: f32[4,32], index: 2, kind: input, shape index: {}]   ;;  %s2778_s3 = inlined_call_operand.vmem [shape: f32[32,96], index: 3, kind: input, shape index: {}]   ;;  %s2779_s4 = inlined_call_operand.vmem [shape: f32[1,96], index: 4, kind: input, shape index: {}]   ;;  %s2780_s5 = inlined_call_operand.vmem [shape: f32[32,32], index: 5, kind: input, shape index: {}]   ;;  %s2781_s6 = inlined_call_operand.vmem [shape: f32[1,32], index: 6, kind: input, shape index: {}]   ;;  %s2782_s7 = inlined_call_operand.vmem [shape: f32[32,64], index: 7, kind: input, shape index: {}]   ;;  %s2783_s8 = inlined_call_operand.hbm [shape: f32[1,64], index: 8, kind: input, shape index: {}]   ;;  %s2784_s9 = inlined_call_operand.vmem [shape: f32[64,32], index: 9, kind: input, shape index: {}]   ;;  %s2785_s10 = inlined_call_operand.vmem [shape: f32[1,32], index: 10, kind: input, shape index: {}]   ;;  %s2786_s11 = inlined_call_operand.hbm [shape: f32[16,32], index: 11, kind: output, shape index: {}]  }
   0x1   :  { %17 = vsyncpa [#allocation6], 0 }
   0x2   :  { %18 = vsyncpa [#allocation9], 0 }
   0x3   :  { %19 = vsyncpa [#allocation4], 0  ;;  %s2382_s17 = smov [#allocation5]   ;;  %s2383_s19 = smov [#allocation2]  }
   0x4   :  { %s37_s18 = sshll.u32 %s2382_s17, 4  ;;  %s25_s20 = sshll.u32 %s2383_s19, 4  ;;  %s38_s18 = int_to_ptr.vmem [resolvable:$true] %s37_s18  ;;  %s2458_s20 = int_to_ptr.vmem [resolvable:$true] %s25_s20 }
   0x5   :  { %s2264_s23 = scalar_lea.hbm %s2776_s1, 256 }
   0x6   :  { %p2265_p0 = scmp.ne.s32.totalorder %s2776_s1, %s2264_s23  ;;  %p2268_p1 = scmp.lt.u32.totalorder %s2264_s23, %s2776_s1 }
   0x8   :  { %p2270_p2 = pnand %p2268_p1, %p2265_p0 }
   0xa   :  { %2273 = shalt.err (!%p2270_p2)
}
   0xb   :  { %s2274_s28 = scalar_lea.vmem %s38_s18, 256  ;;  %p2279_p4 = scmp.lt.s32.totalorder %s38_s18, %s38_s18 }
   0xc   :  { %p2275_p3 = scmp.ne.s32.totalorder %s38_s18, %s2274_s28  ;;  %p2280_p5 = scmp.lt.s32.totalorder %s2274_s28, %s2274_s28 }
   0xe   :  { %p2281_p6 = por %p2280_p5, %p2279_p4 }
  0x10   :  { %p2282_p7 = pnand %p2281_p6, %p2275_p3 }
  0x12   :  { %2285 = shalt.err (!%p2282_p7)
}
  0x13   :  { %s2384_s29 = smov 128   ;;  %s2385_s30 = smov 8  }
  0x14   :  { %43 = dma.hbm_to_vmem [thread:$0]  %s2776_s1, 256, %s38_s18, [#allocation6], %s2384_s29, %s2384_s29, %s2385_s30  }
  0x15   :  { %s2286_s16 = scalar_lea.hbm %s2775_s0, 256 }
  0x16   :  { %p2287_p8 = scmp.ne.s32.totalorder %s2775_s0, %s2286_s16  ;;  %p2290_p9 = scmp.lt.u32.totalorder %s2286_s16, %s2775_s0 }
  0x18   :  { %p2292_p10 = pnand %p2290_p9, %p2287_p8 }
  0x1a   :  { %2295 = shalt.err (!%p2292_p10)
}
  0x1b   :  { %s2296_s23 = scalar_lea.vmem %s2458_s20, 256  ;;  %p2301_p12 = scmp.lt.s32.totalorder %s2458_s20, %s2458_s20 }
  0x1c   :  { %p2297_p11 = scmp.ne.s32.totalorder %s2458_s20, %s2296_s23  ;;  %p2302_p13 = scmp.lt.s32.totalorder %s2296_s23, %s2296_s23 }
  0x1e   :  { %p2303_p0 = por %p2302_p13, %p2301_p12 }
  0x20   :  { %p2304_p1 = pnand %p2303_p0, %p2297_p11 }
  0x22   :  { %2307 = shalt.err (!%p2304_p1)
}
  0x23   :  { %31 = dma.hbm_to_vmem [thread:$0]  %s2775_s0, 256, %s2458_s20, [#allocation3], %s2384_s29, %s2384_s29, %s2385_s30  }
  0x24   :  { %s2386_s24 = smov [#allocation7]   ;;  %s2387_s26 = smov [#allocation8]  }
  0x25   :  { %s50_s25 = sshll.u32 %s2386_s24, 4  ;;  %s70_s27 = sshll.u32 %s2387_s26, 4  ;;  %s51_s25 = int_to_ptr.vmem [resolvable:$true] %s50_s25  ;;  %s71_s27 = int_to_ptr.vmem [resolvable:$true] %s70_s27 }
  0x26   :  { %s2308_s13 = scalar_lea.hbm %s2777_s2, 64 }
  0x27   :  { %p2309_p2 = scmp.ne.s32.totalorder %s2777_s2, %s2308_s13  ;;  %p2312_p3 = scmp.lt.u32.totalorder %s2308_s13, %s2777_s2 }
  0x29   :  { %p2314_p4 = pnand %p2312_p3, %p2309_p2 }
  0x2b   :  { %2317 = shalt.err (!%p2314_p4)
}
  0x2c   :  { %s2318_s0 = scalar_lea.vmem %s51_s25, 64  ;;  %p2323_p6 = scmp.lt.s32.totalorder %s51_s25, %s51_s25 }
  0x2d   :  { %p2319_p5 = scmp.ne.s32.totalorder %s51_s25, %s2318_s0  ;;  %p2324_p7 = scmp.lt.s32.totalorder %s2318_s0, %s2318_s0 }
  0x2f   :  { %p2325_p8 = por %p2324_p7, %p2323_p6 }
  0x31   :  { %p2326_p9 = pnand %p2325_p8, %p2319_p5 }
  0x33   :  { %2329 = shalt.err (!%p2326_p9)
}
  0x34   :  { %53 = dma.hbm_to_vmem [thread:$0]  %s2777_s2, 64, %s51_s25, [#allocation6]  }
  0x35   :  { %s2330_s23 = scalar_lea.hbm %s2783_s8, 16 }
  0x36   :  { %p2331_p10 = scmp.ne.s32.totalorder %s2783_s8, %s2330_s23  ;;  %p2334_p11 = scmp.lt.u32.totalorder %s2330_s23, %s2783_s8 }
  0x38   :  { %p2336_p12 = pnand %p2334_p11, %p2331_p10 }
  0x3a   :  { %2339 = shalt.err (!%p2336_p12)
}
  0x3b   :  { %s2340_s28 = scalar_lea.vmem %s71_s27, 16  ;;  %s2344_s12 = scalar_lea.vmem %s71_s27, 32 }
  0x3c   :  { %p2341_p13 = scmp.ne.s32.totalorder %s71_s27, %s2340_s28  ;;  %p2345_p0 = scmp.lt.s32.totalorder %s71_s27, %s71_s27 }
  0x3d   :  { %p2346_p1 = scmp.lt.s32.totalorder %s2344_s12, %s2340_s28 }
  0x3f   :  { %p2347_p2 = por %p2346_p1, %p2345_p0 }
  0x41   :  { %p2348_p3 = pnand %p2347_p2, %p2341_p13 }
  0x43   :  { %2351 = shalt.err (!%p2348_p3)
}
  0x44   :  { %73 = dma.hbm_to_vmem [thread:$0]  %s2783_s8, 16, %s71_s27, [#allocation9]  }
  0x45   :  { %2374 = dma.done.wait [#allocation3], 256  }
  0x46   :  { %2375 = vsyncadd [#allocation3], 4294967040 }
  0x47   :  { %2376 = dma.done.wait [#allocation6], 320  }
  0x48   :  { %2377 = vsyncadd [#allocation6], 4294966976 }
  0x49   :  { %2378 = dma.done.wait [#allocation9], 16  }
  0x4a   :  { %2379 = vsyncadd [#allocation9], 4294967280  ;;  %vm95_vm0 = vcmask 261120   ;;  %v2519_v0 = vld [vmem:[#allocation2] sm:$0xff]  ;;  %v2521_v1 = vld [vmem:[#allocation2 + $0x8] sm:$0xff]  ;;  %v123_v22 = vlaneseq  ;;  %v2388_v42 = vmov 0.0  }
  0x4b   :  { %v96_v2 = vsel %vm95_vm0, %v2519_v0, 0.0  ;;  %v99_v3 = vsel %vm95_vm0, %v2521_v1, 0.0  ;;  %v135_v14 = vld [vmem:[%s2778_s3] sm:$0xff]  ;;  %v136_v15 = vld [vmem:[%s2778_s3 + $0x8] sm:$0xff]  ;;  %v137_v16 = vld [vmem:[%s2778_s3 + $0x10] sm:$0xff]  ;;  %2057 = vmatprep.subr.mxu0 %v2388_v42  ;;  %vm2389_vm1 = vmmov 0  }
  0x4c   :  { %97 = vadd.xlane.f32.xlu0 %v96_v2  ;;  %v2168_v17 = vpack.c.bf16 %v136_v15, %v135_v14  ;;  %v138_v18 = vld [vmem:[%s2778_s3 + $0x18] sm:$0xff]  ;;  %v2543_v26 = vshrl.u32 %v123_v22, 7  ;;  %v2546_v29 = vld [vmem:[#allocation7] sm:$0xf]  ;;  %2059 = vmatprep.mubr.msk.f32.mxu0 %vm2389_vm1, %v2388_v42  ;;  %s2390_s19 = smov 120   ;;  %s2392_s21 = smov 104  }
  0x4d   :  { %v2172_v19 = vpack.c.bf16 %v138_v18, %v137_v16  ;;  %v1940_v41 = vld [vmem:[%s2779_s4] ss:$0 sm:$0xff]  ;;  %s2391_s4 = smov 112   ;;  %s2393_s22 = smov 96   ;;  %vm243_vm2 = vcmask 64512   ;;  %v93_v63 = vld [vmem:[#allocation5] sm:$0xff] }
  0x4e   :  { %2169 = vmatprep.subr.bf16.mxu1 %v2168_v17  ;;  %v125_v28 = vsub.s32 0, %v2543_v26  ;;  %v131_v30 = vsub.s32 1, %v2543_v26  ;;  %s2394_s23 = smov 64   ;;  %s2396_s8 = smov 24   ;;  %vm1591_vm3 = vcmask 195584   ;;  %vm1588_vm4 = vcmask 130048  }
  0x4f   :  { %2171 = vmatpush3.bf16.msra.mxu1 %v2168_v17  ;;  %vm1835_vm5 = vcmask 523264  }
  0x50   :  { %100 = vadd.xlane.f32.xlu0 %v99_v3  ;;  %2173 = vmatprep.subr.bf16.mxu1 %v2172_v19  ;;  %v126_v31 = vrot.slane %v2546_v29, %v125_v28  ;;  %v132_v34 = vrot.slane %v2546_v29, %v131_v30 }
  0x53   :  { %2175 = vmatpush3.bf16.msra.mxu1 %v2172_v19 }
  0x54   :  { %2047 = vmatprep.subr.mxu1 %v2388_v42 }
  0xd9   :  { %v98_v4 = vpop.xlane.xlu0 %97 }
  0xda   :  { %v103_v5 = vmul.f32 0.03125, %v98_v4 }
  0xdc   :  { %v105_v6 = vsub.f32 %v2519_v0, %v103_v5 }
  0xdd   :  { %v101_v7 = vpop.xlane.xlu0 %100 }
  0xde   :  { %v104_v8 = vmul.f32 0.03125, %v101_v7  ;;  %v107_v9 = vmul.f32 %v105_v6, %v105_v6 }
  0xe0   :  { %v106_v10 = vsub.f32 %v2521_v1, %v104_v8  ;;  %v109_v11 = vsel %vm95_vm0, %v107_v9, 0.0 }
  0xe1   :  { %110 = vadd.xlane.f32.xlu1 %v109_v11 }
  0xe2   :  { %v108_v12 = vmul.f32 %v106_v10, %v106_v10 }
  0xe4   :  { %v112_v13 = vsel %vm95_vm0, %v108_v12, 0.0 }
  0xe5   :  { %113 = vadd.xlane.f32.xlu1 %v112_v13 }
 0x16e   :  { %v111_v20 = vpop.xlane.xlu1 %110 }
 0x16f   :  { %v115_v21 = vmul.f32 0.03125, %v111_v20 }
 0x171   :  { %v117_v23 = vadd.f32 1e-06, %v115_v21 }
 0x172   :  { %v114_v24 = vpop.xlane.xlu1 %113 }
 0x173   :  { %2224 = vrsqrt.f32 %v117_v23  ;;  %v116_v25 = vmul.f32 0.03125, %v114_v24 }
 0x175   :  { %v118_v27 = vadd.f32 1e-06, %v116_v25 }
 0x177   :  { %2226 = vrsqrt.f32 %v118_v27 }
 0x17d   :  { %v2225_v32 = vpop.eup %2224 }
 0x17e   :  { %v121_v33 = vmul.f32 %v2225_v32, %v105_v6  ;;  %v94_v6 = vld [vmem:[#allocation5 + $0x8] sm:$0xff] }
 0x180   :  { %v127_v35 = vmul.f32 %v126_v31, %v121_v33 }
 0x181   :  { %v2227_v36 = vpop.eup %2226 }
 0x182   :  { %v122_v37 = vmul.f32 %v2227_v36, %v106_v10  ;;  %v133_v38 = vadd.f32 %v132_v34, %v127_v35 }
 0x184   :  { %v128_v39 = vmul.f32 %v126_v31, %v122_v37  ;;  %2044 = vmatprep.mubr.msk.f32.mxu1 %vm95_vm0, %v133_v38 }
 0x186   :  { %v134_v40 = vadd.f32 %v132_v34, %v128_v39 }
 0x188   :  { %2045 = vmatmul.mubr.msk.f32.vlgmr.msra.gmra.mrb[0].mxu1 %vm95_vm0, %v134_v40 }
 0x189   :  { %2049 = vmatprep.mubr.msk.f32.mxu1 %vm2389_vm1, %v2388_v42 }
 0x25b   :  { %v2046_v43 = vpop.f32.mrb[0].mxu1 }
 0x25c   :  { %v224_v44 = vadd.f32 %v2046_v43, %v1940_v41  ;;  %v218_v45 = vpop.f32.mrb[1].mxu1 }
 0x25d   :  { %v219_v46 = vadd.f32 %v1940_v41, %v218_v45 }
 0x25e   :  { %231 = vrot.lane.b32.xlu1 %v224_v44, %s2390_s19 }
 0x25f   :  { %229 = vrot.lane.b32.xlu0 %v219_v46, %s2390_s19 }
 0x262   :  { %233 = vrot.lane.b32.xlu1 %v219_v46, %s2391_s4 }
 0x263   :  { %237 = vrot.lane.b32.xlu0 %v219_v46, %s2392_s21 }
 0x266   :  { %235 = vrot.lane.b32.xlu1 %v224_v44, %s2391_s4 }
 0x267   :  { %241 = vrot.lane.b32.xlu0 %v219_v46, %s2393_s22 }
 0x26a   :  { %239 = vrot.lane.b32.xlu1 %v224_v44, %s2392_s21 }
 0x26e   :  { %318 = vrot.lane.b32.xlu1 %v224_v44, %s2393_s22 }
 0x2d0   :  { %v232_v47 = vpop.permute.xlu1 %231 }
 0x2d1   :  { %470 = vrot.lane.b32.xlu1 %v232_v47, %s2393_s22  ;;  %v230_v48 = vpop.permute.xlu0 %229 }
 0x2d2   :  { %394 = vrot.lane.b32.xlu0 %v230_v48, %s2393_s22 }
 0x2d4   :  { %v234_v49 = vpop.permute.xlu1 %233 }
 0x2d5   :  { %v2562_v50 = vpop.permute.xlu0 %237 }
 0x2d6   :  { %546 = vrot.lane.b32.xlu0 %v234_v49, %s2393_s22 }
 0x2d8   :  { %v236_v51 = vpop.permute.xlu1 %235 }
 0x2d9   :  { %622 = vrot.lane.b32.xlu1 %v236_v51, %s2393_s22  ;;  %v242_v52 = vpop.permute.xlu0 %241 }
 0x2da   :  { %698 = vrot.lane.b32.xlu0 %v2562_v50, %s2393_s22  ;;  %2048 = vmatpush3.xpose.msk.msra.mxu1 %vm243_vm2, %v242_v52 }
 0x2db   :  { %2052 = vmatprep.subr.mxu1 %v2388_v42 }
 0x2dc   :  { %v2567_v53 = vpop.permute.xlu1 %239 }
 0x2dd   :  { %774 = vrot.lane.b32.xlu1 %v2567_v53, %s2393_s22  ;;  %2050 = vmatmul.mubr.msk.f32.vlgmr.msra.gmra.mrb[2].mxu1 %vm243_vm2, %v219_v46 }
 0x2de   :  { %946 = vrot.lane.b32.xlu0 %v219_v46, %s2394_s23  ;;  %2054 = vmatprep.mubr.msk.f32.mxu1 %vm2389_vm1, %v2388_v42 }
 0x2e0   :  { %v319_v54 = vpop.permute.xlu1 %318 }
 0x2e1   :  { %1022 = vrot.lane.b32.xlu1 %v224_v44, %s2394_s23  ;;  %2053 = vmatpush3.xpose.msk.msra.mxu1 %vm243_vm2, %v319_v54 }
 0x2e2   :  { %1250 = vrot.lane.b32.xlu0 %v234_v49, %s2394_s23  ;;  %2062 = vmatprep.subr.mxu1 %v2388_v42 }
 0x2e4   :  { %2055 = vmatmul.mubr.msk.f32.vlgmr.msra.gmra.mrb[4].mxu1 %vm243_vm2, %v224_v44 }
 0x2e5   :  { %1174 = vrot.lane.b32.xlu1 %v232_v47, %s2394_s23  ;;  %2064 = vmatprep.mubr.msk.f32.mxu1 %vm2389_vm1, %v2388_v42 }
 0x2e9   :  { %1326 = vrot.lane.b32.xlu1 %v236_v51, %s2394_s23 }
 0x2ed   :  { %1098 = vrot.lane.b32.xlu1 %v230_v48, %s2394_s23 }
 0x343   :  { %v471_v55 = vpop.permute.xlu1 %470 }
 0x344   :  { %2063 = vmatpush3.xpose.msk.msra.mxu1 %vm243_vm2, %v471_v55  ;;  %v395_v56 = vpop.permute.xlu0 %394 }
 0x345   :  { %2058 = vmatpush3.xpose.msk.msra.mxu0 %vm243_vm2, %v395_v56  ;;  %2072 = vmatprep.subr.mxu1 %v2388_v42 }
 0x346   :  { %2067 = vmatprep.subr.mxu0 %v2388_v42 }
 0x347   :  { %2065 = vmatmul.mubr.msk.f32.vlgmr.msra.gmra.mrb[6].mxu1 %vm243_vm2, %v232_v47 }
 0x348   :  { %2060 = vmatmul.mubr.msk.f32.vlgmr.msra.gmra.mrb[0].mxu0 %vm243_vm2, %v230_v48  ;;  %v547_v57 = vpop.permute.xlu0 %546  ;;  %2074 = vmatprep.mubr.msk.f32.mxu1 %vm2389_vm1, %v2388_v42 }
 0x349   :  { %2068 = vmatpush3.xpose.msk.msra.mxu0 %vm243_vm2, %v547_v57  ;;  %2069 = vmatprep.mubr.msk.f32.mxu0 %vm2389_vm1, %v2388_v42 }
 0x34a   :  { %2077 = vmatprep.subr.mxu0 %v2388_v42 }
 0x34b   :  { %v623_v58 = vpop.permute.xlu1 %622 }
 0x34c   :  { %2070 = vmatmul.mubr.msk.f32.vlgmr.msra.gmra.mrb[2].mxu0 %vm243_vm2, %v234_v49  ;;  %2073 = vmatpush3.xpose.msk.msra.mxu1 %vm243_vm2, %v623_v58  ;;  %v699_v59 = vpop.permute.xlu0 %698 }
 0x34d   :  { %2078 = vmatpush3.xpose.msk.msra.mxu0 %vm243_vm2, %v699_v59  ;;  %2079 = vmatprep.mubr.msk.f32.mxu0 %vm2389_vm1, %v2388_v42 }
 0x34e   :  { %2082 = vmatprep.subr.mxu1 %v2388_v42  ;;  %2087 = vmatprep.subr.mxu0 %v2388_v42 }
 0x34f   :  { %v775_v60 = vpop.permute.xlu1 %774  ;;  %2075 = vmatmul.mubr.msk.f32.vlgmr.msra.gmra.mrb[8].mxu1 %vm243_vm2, %v236_v51 }
 0x350   :  { %2080 = vmatmul.mubr.msk.f32.vlgmr.msra.gmra.mrb[4].mxu0 %vm243_vm2, %v2562_v50  ;;  %2083 = vmatpush3.xpose.msk.msra.mxu1 %vm243_vm2, %v775_v60  ;;  %v947_v61 = vpop.permute.xlu0 %946 }
 0x351   :  { %2088 = vmatpush3.msra.mxu0 %v947_v61  ;;  %2084 = vmatprep.mubr.msk.f32.mxu1 %vm2389_vm1, %v2388_v42 }
 0x352   :  { %2092 = vmatprep.subr.mxu1 %v2388_v42  ;;  %2089 = vmatprep.mubr.msk.f32.mxu0 %vm2389_vm1, %v2388_v42 }
 0x353   :  { %v1023_v62 = vpop.permute.xlu1 %1022  ;;  %2085 = vmatmul.mubr.msk.f32.vlgmr.msra.gmra.mrb[10].mxu1 %vm243_vm2, %v2567_v53  ;;  %2097 = vmatprep.subr.mxu0 %v2388_v42 }
 0x354   :  { %2093 = vmatpush3.msra.mxu1 %v1023_v62  ;;  %2094 = vmatprep.mubr.msk.f32.mxu1 %vm2389_vm1, %v2388_v42  ;;  %v1251_v38 = vpop.permute.xlu0 %1250 }
 0x355   :  { %2102 = vmatprep.subr.mxu1 %v2388_v42 }
 0x357   :  { %v1175_v37 = vpop.permute.xlu1 %1174 }
 0x35b   :  { %v1327_v39 = vpop.permute.xlu1 %1326 }
 0x35f   :  { %v1099_v43 = vpop.permute.xlu1 %1098 }
 0x3b0   :  { %v314_v2 = vpop.f32.mrb[2].mxu1 }
 0x3b1   :  { %v850_v3 = vadd.f32 %v314_v2, %v93_v63  ;;  %v2051_v4 = vpop.f32.mrb[3].mxu1 }
 0x3b3   :  { %v858_v5 = vsel %vm243_vm2, %v850_v3, -inf }
 0x3b4   :  { %859 = vmax.xlane.f32.xlu0 %v858_v5 }
 0x3b7   :  { %v390_v7 = vpop.f32.mrb[4].mxu1 }
 0x3b8   :  { %v851_v8 = vadd.f32 %v390_v7, %v94_v6  ;;  %v2056_v9 = vpop.f32.mrb[5].mxu1 }
 0x3ba   :  { %v861_v10 = vsel %vm243_vm2, %v851_v8, -inf }
 0x3bb   :  { %862 = vmax.xlane.f32.xlu1 %v861_v10 }
 0x41a   :  { %v542_v11 = vpop.f32.mrb[6].mxu1 }
 0x41b   :  { %v853_v12 = vadd.f32 %v542_v11, %v94_v6  ;;  %v466_v13 = vpop.f32.mrb[0].mxu0  ;;  %v2066_v14 = vpop.f32.mrb[7].mxu1 }
 0x41c   :  { %v2061_v15 = vpop.f32.mrb[1].mxu0  ;;  %v852_v16 = vadd.f32 %v466_v13, %v93_v63 }
 0x41d   :  { %v867_v17 = vsel %vm243_vm2, %v853_v12, -inf }
 0x41e   :  { %868 = vmax.xlane.f32.xlu0 %v867_v17  ;;  %v864_v21 = vsel %vm243_vm2, %v852_v16, -inf }
 0x41f   :  { %v618_v18 = vpop.f32.mrb[2].mxu0 }
 0x420   :  { %v2071_v19 = vpop.f32.mrb[3].mxu0  ;;  %v854_v20 = vadd.f32 %v618_v18, %v93_v63 }
 0x422   :  { %v694_v22 = vpop.f32.mrb[8].mxu1  ;;  %865 = vmax.xlane.f32.xlu0 %v864_v21  ;;  %v870_v31 = vsel %vm243_vm2, %v854_v20, -inf }
 0x423   :  { %v855_v23 = vadd.f32 %v694_v22, %v94_v6  ;;  %v2076_v24 = vpop.f32.mrb[9].mxu1  ;;  %v770_v25 = vpop.f32.mrb[4].mxu0 }
 0x424   :  { %v2081_v27 = vpop.f32.mrb[5].mxu0  ;;  %v856_v28 = vadd.f32 %v770_v25, %v93_v63 }
 0x425   :  { %v873_v30 = vsel %vm243_vm2, %v855_v23, -inf }
 0x426   :  { %874 = vmax.xlane.f32.xlu1 %v873_v30  ;;  %v846_v32 = vpop.f32.mrb[10].mxu1  ;;  %871 = vmax.xlane.f32.xlu0 %v870_v31  ;;  %v876_v36 = vsel %vm243_vm2, %v856_v28, -inf  ;;  %v1594_v31 = vld [vmem:[%s2780_s5] sm:$0xff] }
 0x427   :  { %v857_v33 = vadd.f32 %v846_v32, %v94_v6  ;;  %v2086_v34 = vpop.f32.mrb[11].mxu1  ;;  %v1595_v32 = vld [vmem:[%s2780_s5 + $0x8] sm:$0xff] }
 0x429   :  { %v879_v35 = vsel %vm243_vm2, %v857_v33, -inf }
 0x42a   :  { %880 = vmax.xlane.f32.xlu1 %v879_v35  ;;  %877 = vmax.xlane.f32.xlu0 %v876_v36 }
 0x43b   :  { %1478 = vrot.lane.b32.xlu1 %v2567_v53, %s2394_s23 }
 0x440   :  { %1402 = vrot.lane.b32.xlu0 %v2562_v50, %s2394_s23 }
 0x441   :  { %v860_v40 = vpop.xlane.xlu0 %859 }
 0x442   :  { %v882_v41 = vsub.f32 %v850_v3, %v860_v40  ;;  %v1597_v40 = vld [vmem:[%s2780_s5 + $0x18] sm:$0xff] }
 0x444   :  { %v890_v44 = vmul.f32 1.442695, %v882_v41 }
 0x446   :  { %2228 = vpow2.f32 %v890_v44 }
 0x448   :  { %v863_v45 = vpop.xlane.xlu1 %862 }
 0x449   :  { %v883_v46 = vsub.f32 %v851_v8, %v863_v45 }
 0x44b   :  { %v892_v47 = vmul.f32 1.442695, %v883_v46 }
 0x44d   :  { %2230 = vpow2.f32 %v892_v47 }
 0x450   :  { %v2630_v48 = vpop.eup %2228 }
 0x451   :  { %2090 = vmatmul.mubr.msk.f32.vlgmr.msra.gmra.mrb[6].mxu0 %vm243_vm2, %v2630_v48 }
 0x452   :  { %2098 = vmatpush3.msra.mxu0 %v1099_v43  ;;  %2099 = vmatprep.mubr.msk.f32.mxu0 %vm2389_vm1, %v2388_v42 }
 0x453   :  { %2107 = vmatprep.subr.mxu0 %v2388_v42 }
 0x457   :  { %v2637_v49 = vpop.eup %2230 }
 0x458   :  { %2095 = vmatmul.mubr.msk.f32.vlgmr.msra.gmra.mrb[12].mxu1 %vm243_vm2, %v2637_v49  ;;  %v909_v19 = vsel %vm243_vm2, %v2637_v49, 0.0 }
 0x459   :  { %2103 = vmatpush3.msra.mxu1 %v1175_v37  ;;  %2104 = vmatprep.mubr.msk.f32.mxu1 %vm2389_vm1, %v2388_v42 }
 0x45a   :  { %2112 = vmatprep.subr.mxu1 %v2388_v42 }
 0x4ab   :  { %v869_v50 = vpop.xlane.xlu0 %868 }
 0x4ac   :  { %v885_v51 = vsub.f32 %v853_v12, %v869_v50 }
 0x4ae   :  { %v896_v52 = vmul.f32 1.442695, %v885_v51 }
 0x4af   :  { %v866_v53 = vpop.xlane.xlu0 %865 }
 0x4b0   :  { %2232 = vpow2.f32 %v896_v52  ;;  %v884_v54 = vsub.f32 %v852_v16, %v866_v53 }
 0x4b2   :  { %v894_v55 = vmul.f32 1.442695, %v884_v54 }
 0x4b3   :  { %v875_v56 = vpop.xlane.xlu1 %874  ;;  %v872_v57 = vpop.xlane.xlu0 %871 }
 0x4b4   :  { %2234 = vpow2.f32 %v894_v55  ;;  %v887_v58 = vsub.f32 %v855_v23, %v875_v56  ;;  %v886_v59 = vsub.f32 %v854_v20, %v872_v57 }
 0x4b6   :  { %v900_v60 = vmul.f32 1.442695, %v887_v58  ;;  %v898_v61 = vmul.f32 1.442695, %v886_v59 }
 0x4b7   :  { %v881_v62 = vpop.xlane.xlu1 %880  ;;  %v878_v63 = vpop.xlane.xlu0 %877 }
 0x4b8   :  { %2236 = vpow2.f32 %v900_v60  ;;  %v889_v2 = vsub.f32 %v857_v33, %v881_v62  ;;  %v888_v3 = vsub.f32 %v856_v28, %v878_v63  ;;  %v2176_v33 = vpack.c.bf16 %v1595_v32, %v1594_v31 }
 0x4b9   :  { %2238 = vpow2.f32 %v898_v61 }
 0x4ba   :  { %v2233_v4 = vpop.eup %2232  ;;  %v904_v5 = vmul.f32 1.442695, %v889_v2  ;;  %v902_v6 = vmul.f32 1.442695, %v888_v3 }
 0x4bb   :  { %2105 = vmatmul.mubr.msk.f32.vlgmr.msra.gmra.mrb[14].mxu1 %vm243_vm2, %v2233_v4  ;;  %v915_v7 = vsel %vm243_vm2, %v2233_v4, 0.0  ;;  %v1479_v12 = vpop.permute.xlu1 %1478  ;;  %v1403_v14 = vpop.permute.xlu0 %1402 }
 0x4bc   :  { %2240 = vpow2.f32 %v904_v5  ;;  %2113 = vmatpush3.msra.mxu1 %v1327_v39  ;;  %916 = vadd.xlane.f32.xlu1 %v915_v7  ;;  %v1596_v39 = vld [vmem:[%s2780_s5 + $0x10] sm:$0xff]  ;;  %s2395_s5 = smov 16  }
 0x4bd   :  { %2242 = vpow2.f32 %v902_v6  ;;  %2114 = vmatprep.mubr.msk.f32.mxu1 %vm2389_vm1, %v2388_v42  ;;  %2122 = vmatprep.subr.mxu1 %v2388_v42  ;;  %v2180_v43 = vpack.c.bf16 %v1597_v40, %v1596_v39  ;;  %v1727_v39 = vld [vmem:[%s2782_s7 + $0x8] sm:$0xff] }
 0x4be   :  { %v2235_v8 = vpop.eup %2234 }
 0x4bf   :  { %2100 = vmatmul.mubr.msk.f32.vlgmr.msra.gmra.mrb[8].mxu0 %vm243_vm2, %v2235_v8  ;;  %v912_v9 = vsel %vm243_vm2, %v2235_v8, 0.0 }
 0x4c0   :  { %2108 = vmatpush3.msra.mxu0 %v1251_v38  ;;  %913 = vadd.xlane.f32.xlu0 %v912_v9 }
 0x4c1   :  { %2109 = vmatprep.mubr.msk.f32.mxu0 %vm2389_vm1, %v2388_v42  ;;  %2117 = vmatprep.subr.mxu0 %v2388_v42 }
 0x4c2   :  { %v2237_v10 = vpop.eup %2236 }
 0x4c3   :  { %v2239_v11 = vpop.eup %2238  ;;  %2115 = vmatmul.mubr.msk.f32.vlgmr.msra.gmra.mrb[16].mxu1 %vm243_vm2, %v2237_v10  ;;  %v921_v13 = vsel %vm243_vm2, %v2237_v10, 0.0 }
 0x4c4   :  { %2110 = vmatmul.mubr.msk.f32.vlgmr.msra.gmra.mrb[10].mxu0 %vm243_vm2, %v2239_v11  ;;  %2123 = vmatpush3.msra.mxu1 %v1479_v12  ;;  %v918_v18 = vsel %vm243_vm2, %v2239_v11, 0.0 }
 0x4c5   :  { %2118 = vmatpush3.msra.mxu0 %v1403_v14  ;;  %922 = vadd.xlane.f32.xlu0 %v921_v13 }
 0x4c6   :  { %v2241_v15 = vpop.eup %2240  ;;  %2119 = vmatprep.mubr.msk.f32.mxu0 %vm2389_vm1, %v2388_v42  ;;  %2124 = vmatprep.mubr.msk.f32.mxu1 %vm2389_vm1, %v2388_v42  ;;  %v906_v42 = vsel %vm243_vm2, %v2630_v48, 0.0 }
 0x4c7   :  { %v2243_v16 = vpop.eup %2242  ;;  %2125 = vmatmul.mubr.msk.f32.vlgmr.msra.gmra.mrb[18].mxu1 %vm243_vm2, %v2241_v15  ;;  %v927_v17 = vsel %vm243_vm2, %v2241_v15, 0.0  ;;  %2177 = vmatprep.subr.bf16.mxu0 %v2176_v33 }
 0x4c8   :  { %2120 = vmatmul.mubr.msk.f32.vlgmr.msra.gmra.mrb[12].mxu0 %vm243_vm2, %v2243_v16  ;;  %928 = vadd.xlane.f32.xlu1 %v927_v17  ;;  %v924_v20 = vsel %vm243_vm2, %v2243_v16, 0.0 }
 0x4c9   :  { %919 = vadd.xlane.f32.xlu0 %v918_v18  ;;  %2179 = vmatpush3.bf16.msra.mxu0 %v2176_v33 }
 0x4ca   :  { %2181 = vmatprep.subr.bf16.mxu0 %v2180_v43 }
 0x4cc   :  { %910 = vadd.xlane.f32.xlu1 %v909_v19 }
 0x4cd   :  { %925 = vadd.xlane.f32.xlu0 %v924_v20  ;;  %2183 = vmatpush3.bf16.msra.mxu0 %v2180_v43  ;;  %v1967_v20 = vld [vmem:[%s2781_s6] ss:$0 sm:$0xff]  ;;  %v1729_v43 = vld [vmem:[%s2782_s7 + $0x18] sm:$0xff] }
 0x4d1   :  { %907 = vadd.xlane.f32.xlu0 %v906_v42 }
 0x524   :  { %v2670_v21 = vpop.f32.mrb[6].mxu0 }
 0x525   :  { %v2091_v22 = vpop.f32.mrb[7].mxu0 }
 0x52b   :  { %v2672_v23 = vpop.f32.mrb[12].mxu1 }
 0x52c   :  { %v2096_v24 = vpop.f32.mrb[13].mxu1 }
 0x549   :  { %v917_v27 = vpop.xlane.xlu1 %916 }
 0x54a   :  { %2244 = vrcp.f32 %v917_v27 }
 0x54d   :  { %v914_v25 = vpop.xlane.xlu0 %913 }
 0x54e   :  { %2246 = vrcp.f32 %v914_v25 }
 0x552   :  { %v923_v28 = vpop.xlane.xlu0 %922 }
 0x553   :  { %2248 = vrcp.f32 %v923_v28 }
 0x554   :  { %v2245_v34 = vpop.eup %2244 }
 0x555   :  { %v929_v41 = vpop.xlane.xlu1 %928 }
 0x556   :  { %v920_v30 = vpop.xlane.xlu0 %919 }
 0x557   :  { %2250 = vrcp.f32 %v920_v30 }
 0x558   :  { %v2247_v44 = vpop.eup %2246 }
 0x559   :  { %v911_v3 = vpop.xlane.xlu1 %910 }
 0x55a   :  { %v926_v35 = vpop.xlane.xlu0 %925 }
 0x55b   :  { %2252 = vrcp.f32 %v926_v35 }
 0x55c   :  { %2254 = vrcp.f32 %v929_v41  ;;  %v1728_v41 = vld [vmem:[%s2782_s7 + $0x10] sm:$0xff] }
 0x55d   :  { %v2249_v48 = vpop.eup %2248 }
 0x55e   :  { %v908_v2 = vpop.xlane.xlu0 %907 }
 0x55f   :  { %2256 = vrcp.f32 %v908_v2 }
 0x560   :  { %2258 = vrcp.f32 %v911_v3 }
 0x561   :  { %v2251_v54 = vpop.eup %2250 }
 0x565   :  { %v2253_v56 = vpop.eup %2252 }
 0x566   :  { %v2255_v62 = vpop.eup %2254 }
 0x569   :  { %v2257_v5 = vpop.eup %2256 }
 0x56a   :  { %v2259_v8 = vpop.eup %2258  ;;  %v1554_v9 = vmul.f32 %v2257_v5, %v2670_v21 }
 0x56b   :  { %v1555_v12 = vmul.f32 %v2259_v8, %v2672_v23 }
 0x58e   :  { %v1246_v36 = vpop.f32.mrb[14].mxu1 }
 0x58f   :  { %v1557_v37 = vmul.f32 %v2245_v34, %v1246_v36  ;;  %v2106_v38 = vpop.f32.mrb[15].mxu1 }
 0x590   :  { %v1726_v38 = vld [vmem:[%s2782_s7] sm:$0xff] }
 0x591   :  { %1566 = vrot.lane.b32.xlu1 %v1557_v37, %s2385_s30  ;;  %v2184_v40 = vpack.c.bf16 %v1727_v39, %v1726_v38 }
 0x592   :  { %v1170_v45 = vpop.f32.mrb[8].mxu0 }
 0x593   :  { %v1556_v46 = vmul.f32 %v2247_v44, %v1170_v45  ;;  %v2101_v47 = vpop.f32.mrb[9].mxu0  ;;  %2185 = vmatprep.subr.bf16.mxu1 %v2184_v40  ;;  %v2188_v44 = vpack.c.bf16 %v1729_v43, %v1728_v41  ;;  %v1820_v45 = vld [vmem:[%s2784_s9] sm:$0xff] }
 0x594   :  { %2187 = vmatpush3.bf16.msra.mxu1 %v2184_v40  ;;  %v1822_v47 = vld [vmem:[%s2784_s9 + $0x10] sm:$0xff] }
 0x595   :  { %1564 = vrot.lane.b32.xlu0 %v1556_v46, %s2385_s30  ;;  %2189 = vmatprep.subr.bf16.mxu1 %v2188_v44  ;;  %v1821_v46 = vld [vmem:[%s2784_s9 + $0x8] sm:$0xff] }
 0x596   :  { %v1398_v49 = vpop.f32.mrb[16].mxu1 }
 0x597   :  { %v1322_v50 = vpop.f32.mrb[10].mxu0  ;;  %v1559_v51 = vmul.f32 %v2249_v48, %v1398_v49  ;;  %v2116_v52 = vpop.f32.mrb[17].mxu1  ;;  %v2192_v48 = vpack.c.bf16 %v1821_v46, %v1820_v45  ;;  %v1823_v49 = vld [vmem:[%s2784_s9 + $0x18] sm:$0xff] }
 0x598   :  { %v2111_v53 = vpop.f32.mrb[11].mxu0  ;;  %v1558_v57 = vmul.f32 %v2251_v54, %v1322_v50  ;;  %2191 = vmatpush3.bf16.msra.mxu1 %v2188_v44  ;;  %v2196_v50 = vpack.c.bf16 %v1823_v49, %v1822_v47  ;;  %v1825_v52 = vld [vmem:[%s2784_s9 + $0x28] sm:$0xff] }
 0x599   :  { %1574 = vrot.lane.b32.xlu1 %v1559_v51, %s2395_s5  ;;  %v1824_v51 = vld [vmem:[%s2784_s9 + $0x20] sm:$0xff]  ;;  %2193 = vmatprep.subr.bf16.mxu0 %v2192_v48 }
 0x59a   :  { %v1550_v55 = vpop.f32.mrb[18].mxu1  ;;  %v2200_v53 = vpack.c.bf16 %v1825_v52, %v1824_v51 }
 0x59b   :  { %v1474_v58 = vpop.f32.mrb[12].mxu0  ;;  %v2126_v59 = vpop.f32.mrb[19].mxu1  ;;  %v1561_v63 = vmul.f32 %v2255_v62, %v1550_v55 }
 0x59c   :  { %v1560_v60 = vmul.f32 %v2253_v56, %v1474_v58  ;;  %v2121_v61 = vpop.f32.mrb[13].mxu0 }
 0x59d   :  { %1572 = vrot.lane.b32.xlu1 %v1558_v57, %s2395_s5  ;;  %v1722_v61 = vsub.s32 3, %v2543_v26 }
 0x59e   :  { %1580 = vrot.lane.b32.xlu0 %v1560_v60, %s2396_s8  ;;  %v1716_v60 = vsub.s32 2, %v2543_v26  ;;  %v1826_v26 = vld [vmem:[%s2784_s9 + $0x30] sm:$0xff] }
 0x59f   :  { %v1723_v3 = vrot.slane %v2546_v29, %v1722_v61 }
 0x5a0   :  { %v1717_v62 = vrot.slane %v2546_v29, %v1716_v60  ;;  %v1970_v29 = vld [vmem:[#allocation8] ss:$0 sm:$0xff] }
 0x5a1   :  { %1582 = vrot.lane.b32.xlu1 %v1561_v63, %s2396_s8 }
 0x603   :  { %v1567_v4 = vpop.permute.xlu1 %1566 }
 0x604   :  { %v1587_v16 = vsel %vm243_vm2, %v1555_v12, %v1567_v4 }
 0x607   :  { %v1565_v7 = vpop.permute.xlu0 %1564 }
 0x608   :  { %v1586_v10 = vsel %vm243_vm2, %v1554_v9, %v1565_v7 }
 0x60b   :  { %v1575_v6 = vpop.permute.xlu1 %1574 }
 0x60c   :  { %v1590_v17 = vsel %vm1588_vm4, %v1587_v16, %v1575_v6 }
 0x60f   :  { %v1573_v11 = vpop.permute.xlu1 %1572 }
 0x610   :  { %v1589_v13 = vsel %vm1588_vm4, %v1586_v10, %v1573_v11  ;;  %v1581_v14 = vpop.permute.xlu0 %1580  ;;  %v1827_v10 = vld [vmem:[%s2784_s9 + $0x38] sm:$0xff]  ;;  %s2397_s9 = smov [#allocation10]  }
 0x611   :  { %v1592_v15 = vsel %vm1591_vm3, %v1589_v13, %v1581_v14  ;;  %v2204_v11 = vpack.c.bf16 %v1827_v10, %v1826_v26  ;;  %s1926_s6 = sshll.u32 %s2397_s9, 4  ;;  %s1927_s6 = int_to_ptr.vmem [resolvable:$true] %s1926_s6 }
 0x612   :  { %2135 = vmatprep.mubr.msk.f32.mxu0 %vm95_vm0, %v1592_v15  ;;  %s2352_s14 = scalar_lea.vmem %s1927_s6, 256  ;;  %p2357_p5 = scmp.lt.s32.totalorder %s1927_s6, %s1927_s6 }
 0x613   :  { %v1583_v18 = vpop.permute.xlu1 %1582  ;;  %p2353_p4 = scmp.ne.s32.totalorder %s1927_s6, %s2352_s14  ;;  %p2358_p6 = scmp.lt.s32.totalorder %s2352_s14, %s2352_s14 }
 0x614   :  { %v1593_v19 = vsel %vm1591_vm3, %v1590_v17, %v1583_v18  ;;  %v1973_v18 = vld [vmem:[%s2785_s10] ss:$0 sm:$0xff] }
 0x615   :  { %2136 = vmatmul.mubr.msk.f32.vlgmr.msra.gmra.mrb[14].mxu0 %vm95_vm0, %v1593_v19  ;;  %p2359_p7 = por %p2358_p6, %p2357_p5 }
 0x616   :  { %2195 = vmatpush3.bf16.msra.mxu0 %v2192_v48 }
 0x617   :  { %2197 = vmatprep.subr.bf16.mxu0 %v2196_v50  ;;  %p2360_p8 = pnand %p2359_p7, %p2353_p4 }
 0x61a   :  { %2199 = vmatpush3.bf16.msra.mxu0 %v2196_v50 }
 0x61b   :  { %2201 = vmatprep.subr.bf16.mxu0 %v2200_v53 }
 0x61e   :  { %2203 = vmatpush3.bf16.msra.mxu0 %v2200_v53 }
 0x61f   :  { %2205 = vmatprep.subr.bf16.mxu0 %v2204_v11 }
 0x622   :  { %2207 = vmatpush3.bf16.msra.mxu0 %v2204_v11 }
 0x6e8   :  { %v2137_v42 = vpop.f32.mrb[14].mxu0 }
 0x6e9   :  { %v1683_v21 = vadd.f32 %v2137_v42, %v1967_v20  ;;  %v1677_v22 = vpop.f32.mrb[15].mxu0 }
 0x6ea   :  { %v1678_v23 = vadd.f32 %v1967_v20, %v1677_v22 }
 0x6eb   :  { %v2698_v24 = vadd.f32 %v1683_v21, %v2521_v1 }
 0x6ec   :  { %v2701_v25 = vadd.f32 %v1678_v23, %v2519_v0 }
 0x6ed   :  { %v1691_v27 = vsel %vm95_vm0, %v2698_v24, 0.0 }
 0x6ee   :  { %1692 = vadd.xlane.f32.xlu1 %v1691_v27  ;;  %v1688_v28 = vsel %vm95_vm0, %v2701_v25, 0.0 }
 0x6ef   :  { %1689 = vadd.xlane.f32.xlu0 %v1688_v28 }
 0x77b   :  { %v1693_v30 = vpop.xlane.xlu1 %1692 }
 0x77c   :  { %v1695_v31 = vmul.f32 0.03125, %v1693_v30  ;;  %v1690_v32 = vpop.xlane.xlu0 %1689 }
 0x77d   :  { %v1694_v33 = vmul.f32 0.03125, %v1690_v32 }
 0x77e   :  { %v1697_v34 = vsub.f32 %v2698_v24, %v1695_v31 }
 0x77f   :  { %v1696_v1 = vsub.f32 %v2701_v25, %v1694_v33 }
 0x780   :  { %v1699_v36 = vmul.f32 %v1697_v34, %v1697_v34 }
 0x781   :  { %v1698_v35 = vmul.f32 %v1696_v1, %v1696_v1 }
 0x782   :  { %v1703_v37 = vsel %vm95_vm0, %v1699_v36, 0.0 }
 0x783   :  { %v1700_v0 = vsel %vm95_vm0, %v1698_v35, 0.0 }
 0x784   :  { %1701 = vadd.xlane.f32.xlu0 %v1700_v0 }
 0x788   :  { %1704 = vadd.xlane.f32.xlu0 %v1703_v37 }
 0x811   :  { %v1702_v54 = vpop.xlane.xlu0 %1701 }
 0x812   :  { %v1706_v55 = vmul.f32 0.03125, %v1702_v54 }
 0x814   :  { %v1708_v56 = vadd.f32 1e-06, %v1706_v55 }
 0x815   :  { %v1705_v57 = vpop.xlane.xlu0 %1704 }
 0x816   :  { %2260 = vrsqrt.f32 %v1708_v56  ;;  %v1707_v58 = vmul.f32 0.03125, %v1705_v57 }
 0x818   :  { %v1709_v59 = vadd.f32 1e-06, %v1707_v58 }
 0x81a   :  { %2262 = vrsqrt.f32 %v1709_v59 }
 0x820   :  { %v2261_v63 = vpop.eup %2260 }
 0x821   :  { %v1712_v2 = vmul.f32 %v2261_v63, %v1696_v1 }
 0x823   :  { %v1718_v4 = vmul.f32 %v1717_v62, %v1712_v2 }
 0x824   :  { %v2263_v5 = vpop.eup %2262 }
 0x825   :  { %v1713_v6 = vmul.f32 %v2263_v5, %v1697_v34  ;;  %v1724_v7 = vadd.f32 %v1723_v3, %v1718_v4 }
 0x827   :  { %v1719_v8 = vmul.f32 %v1717_v62, %v1713_v6  ;;  %2146 = vmatprep.mubr.msk.f32.mxu1 %vm95_vm0, %v1724_v7 }
 0x829   :  { %v1725_v9 = vadd.f32 %v1723_v3, %v1719_v8 }
 0x82b   :  { %2147 = vmatmul.mubr.msk.f32.vlgmr.msra.gmra.mrb[20].mxu1 %vm95_vm0, %v1725_v9 }
 0x8fe   :  { %v2148_v12 = vpop.f32.mrb[20].mxu1 }
 0x8ff   :  { %v1815_v13 = vadd.f32 %v2148_v12, %v1970_v29  ;;  %v1809_v14 = vpop.f32.mrb[21].mxu1 }
 0x900   :  { %v1810_v15 = vadd.f32 %v1970_v29, %v1809_v14 }
 0x901   :  { %v1819_v17 = vmax.f32 %v1815_v13, 0.0 }
 0x902   :  { %v1818_v16 = vmax.f32 %v1810_v15, 0.0 }
 0x904   :  { %2165 = vmatprep.mubr.msk.f32.mxu0 %vm1835_vm5, %v1818_v16 }
 0x905   :  { %2166 = vmatmul.mubr.msk.f32.vlgmr.msra.gmra.mrb[16].mxu0 %vm1835_vm5, %v1819_v17 }
 0x9d8   :  { %v2167_v19 = vpop.f32.mrb[16].mxu0 }
 0x9d9   :  { %v1914_v20 = vadd.f32 %v2167_v19, %v1973_v18  ;;  %v1908_v42 = vpop.f32.mrb[17].mxu0 }
 0x9da   :  { %v1909_v21 = vadd.f32 %v1973_v18, %v1908_v42 }
 0x9db   :  { %v1918_v22 = vadd.f32 %v1914_v20, %v2698_v24 }
 0x9dc   :  { %v1917_v23 = vadd.f32 %v1909_v21, %v2701_v25 }
 0x9dd   :  { %1920 = vst.msk [vmem:[#allocation10 + $0x8] sm:$0xff] %vm95_vm0, %v1918_v22 }
 0x9de   :  { %1919 = vst.msk [vmem:[#allocation10] sm:$0xff] %vm95_vm0, %v1917_v23 }
 0x9df   :  { %2363 = shalt.err (!%p2360_p8)
}
 0x9e0   :  { %s2364_s16 = scalar_lea.hbm %s2786_s11, 256 }
 0x9e1   :  { %p2365_p9 = scmp.ne.s32.totalorder %s2786_s11, %s2364_s16  ;;  %p2368_p10 = scmp.lt.u32.totalorder %s2364_s16, %s2786_s11 }
 0x9e3   :  { %p2370_p11 = pnand %p2368_p10, %p2365_p9 }
 0x9e5   :  { %2373 = shalt.err (!%p2370_p11)
}
 0x9e6   :  { %1932 = dma.vmem_to_hbm [thread:$0]  %s1927_s6, 256, %s2786_s11, [#allocation4], %s2384_s29, %s2384_s29, %s2385_s30  }
 0x9e7   :  { %2380 = dma.done.wait [#allocation4], 256  }
 0x9e8   :  { %2381 = vsyncadd [#allocation4], 4294967040 }
 0x9e9   :  { %1936 = vsyncpa [#allocation3], 1 }
 0x9ea   :  { %1937 = vsyncpa [#allocation6], 1 }
 0x9eb   :  { %1938 = vsyncpa [#allocation9], 1 }
 0x9ec   :  { %1939 = vsyncpa [#allocation4], 1 }

</bundles_post_ra>
